<compile_context>
chip_gen: v5e
topology: v5e:2x2
jax: 0.10.0
libtpu: 0.0.40
codegen_flags: <defaults>
</compile_context>

<pallas_src>
import math

import jax
import jax.numpy as jnp
from jax.experimental import pallas as pl
from jax.experimental.pallas import tpu as pltpu

BN_EPS = 1e-5
LEAKY_SLOPE = 0.1


def _round_up(x, m):
    return ((x + m - 1) // m) * m


# ---------------------------------------------------------------------------
# Kernel: one batch tile per grid step.
#   x_ref  : (TM, input_dim)        bf16
#   w1_ref : (input_dim, bottleneck) bf16   (BN folded in)
#   b1_ref : (1, bottleneck)        f32    (BN folded in)
#   w2_ref : (bottleneck, Cpad)     bf16   (class dim zero-padded to mult. 128)
#   b2_ref : (1, Cpad)              f32
#   o_ref  : (TM, Cpad)             f32
# ---------------------------------------------------------------------------
def classblock_kernel(x_ref, w1_ref, b1_ref, w2_ref, b2_ref, o_ref):
    # Linear(input_dim -> bottleneck) with BN folded in; f32 accumulate.
    h = jnp.dot(x_ref[...], w1_ref[...],
                preferred_element_type=jnp.float32) + b1_ref[...]
    # LeakyReLU(0.1) in f32 (keep elementwise math f32 for v5e VPU).
    h = jnp.where(h >= 0.0, h, LEAKY_SLOPE * h)
    # Dropout(p=0.5): identity in eval mode.
    # classifier Linear(bottleneck -> class_num), bf16 MXU inputs, f32 acc.
    o_ref[...] = (jnp.dot(h.astype(w2_ref.dtype), w2_ref[...],
                          preferred_element_type=jnp.float32)
                  + b2_ref[...]).astype(o_ref.dtype)


# ---------------------------------------------------------------------------
# One-time parameter preparation: fold BN, transpose, pad, cast.
# ---------------------------------------------------------------------------
def prepare_params(params, compute_dtype=jnp.bfloat16):
    w1 = params["w1"].astype(jnp.float32)            # (input_dim, bottleneck)
    b1 = params["b1"].astype(jnp.float32)            # (bottleneck,)
    gamma = params["gamma"].astype(jnp.float32)
    beta = params["beta"].astype(jnp.float32)
    mean = params["running_mean"].astype(jnp.float32)
    var = params["running_var"].astype(jnp.float32)
    w2 = params["w2"].astype(jnp.float32)            # (bottleneck, class_num)
    b2 = params["b2"].astype(jnp.float32)            # (class_num,)

    bottleneck, class_num = w2.shape

    # Fold eval-mode BatchNorm into the first Linear.
    scale = gamma * jax.lax.rsqrt(var + BN_EPS)                  # (bottleneck,)
    w1_f = (w1 * scale[None, :]).astype(compute_dtype)           # bf16
    b1_f = ((b1 - mean) * scale + beta).reshape(1, -1)           # f32 (1, B)

    # Lane-dense classifier: pad class_num up to a multiple of 128.
    cpad = _round_up(class_num, 128)
    w2_p = jnp.zeros((bottleneck, cpad), compute_dtype).at[:, :class_num].set(
        w2.astype(compute_dtype))
    b2_p = jnp.zeros((1, cpad), jnp.float32).at[:, :class_num].set(
        b2.reshape(1, -1))

    return {
        "w1": w1_f, "b1": b1_f, "w2": w2_p, "b2": b2_p,
        "class_num": class_num, "cpad": cpad,
        "input_dim": w1_f.shape[0], "bottleneck": bottleneck,
        "compute_dtype": compute_dtype,
    }


# ---------------------------------------------------------------------------
# Forward wrapper.
# ---------------------------------------------------------------------------
def class_block_forward(x, prep, *, tm=256):
    """x: (N, input_dim). Returns (N, class_num) float32."""
    n, input_dim = x.shape
    assert input_dim == prep["input_dim"]
    bottleneck = prep["bottleneck"]
    class_num = prep["class_num"]
    cpad = prep["cpad"]
    cdt = prep["compute_dtype"]

    # Batch tile: TM=256 targets v6e/v7x MXU; for tiny demos shrink to a
    # multiple of 8 that covers N.
    tm_eff = min(tm, _round_up(n, 8))
    n_pad = _round_up(n, tm_eff)

    x_p = x.astype(cdt)
    if n_pad != n:
        x_p = jnp.pad(x_p, ((0, n_pad - n), (0, 0)))

    grid = (pl.cdiv(n_pad, tm_eff),)

    # VMEM budget (x2 for double buffering + margin); sized from actual tiles
    # so it also fits v7x's 64 MiB VMEM.
    tile_bytes = (
        tm_eff * input_dim * 2            # x tile (bf16)
        + input_dim * bottleneck * 2      # w1 (bf16)
        + 8 * bottleneck * 4              # b1 (f32, sublane-padded)
        + bottleneck * cpad * 2           # w2 (bf16)
        + 8 * cpad * 4                    # b2 (f32, sublane-padded)
        + tm_eff * cpad * 4)              # out tile (f32)
    vmem_limit = min(96 * 2**20, max(4 * tile_bytes, 8 * 2**20))

    out = pl.pallas_call(
        classblock_kernel,
        out_shape=jax.ShapeDtypeStruct((n_pad, cpad), jnp.float32),
        grid_spec=pltpu.PrefetchScalarGridSpec(
            num_scalar_prefetch=0,
            grid=grid,
            in_specs=[
                pl.BlockSpec((tm_eff, input_dim), lambda i: (i, 0)),     # x
                pl.BlockSpec((input_dim, bottleneck), lambda i: (0, 0)), # w1
                pl.BlockSpec((1, bottleneck), lambda i: (0, 0)),         # b1
                pl.BlockSpec((bottleneck, cpad), lambda i: (0, 0)),      # w2
                pl.BlockSpec((1, cpad), lambda i: (0, 0)),               # b2
            ],
            out_specs=pl.BlockSpec((tm_eff, cpad), lambda i: (i, 0)),
        ),
        compiler_params=pltpu.CompilerParams(
            dimension_semantics=("parallel",),
            vmem_limit_bytes=int(vmem_limit)),
    )(x_p, prep["w1"], prep["b1"], prep["w2"], prep["b2"])

    # Drop batch padding and the phantom (zero-padded) class columns.
    return out[:n, :class_num]


# ---------------------------------------------------------------------------
# Deterministic init matching weights_init_kaiming / weights_init_classifier.
# ---------------------------------------------------------------------------
def init_params(key, input_dim, class_num, num_bottleneck=512):
    k1, k2, k3 = jax.random.split(key, 3)

    # Linear(input_dim, bottleneck): kaiming_normal(a=0, mode='fan_out')
    # PyTorch weight is (out, in); fan_out = num_bottleneck; gain = sqrt(2).
    std1 = math.sqrt(2.0 / num_bottleneck)
    w1_pt = std1 * jax.random.normal(k1, (num_bottleneck, input_dim), jnp.float32)
    b1 = jnp.zeros((num_bottleneck,), jnp.float32)

    # BatchNorm1d: weight ~ N(1.0, 0.02), bias = 0, fresh running stats.
    gamma = 1.0 + 0.02 * jax.random.normal(k2, (num_bottleneck,), jnp.float32)
    beta = jnp.zeros((num_bottleneck,), jnp.float32)
    running_mean = jnp.zeros((num_bottleneck,), jnp.float32)
    running_var = jnp.ones((num_bottleneck,), jnp.float32)

    # classifier Linear(bottleneck, class_num): N(0, 0.001), bias = 0.
    w2_pt = 0.001 * jax.random.normal(k3, (class_num, num_bottleneck), jnp.float32)
    b2 = jnp.zeros((class_num,), jnp.float32)

    return {
        "w1": w1_pt.T,   # stored transposed: (input_dim, bottleneck)
        "b1": b1,
        "gamma": gamma,
        "beta": beta,
        "running_mean": running_mean,
        "running_var": running_var,
        "w2": w2_pt.T,   # (bottleneck, class_num)
        "b2": b2,
    }


# ---------------------------------------------------------------------------
# Pure-JAX references.
# ---------------------------------------------------------------------------
def class_block_ref_f32(x, p):
    """Full-precision eval-mode reference (matches the PyTorch module)."""
    h = x @ p["w1"] + p["b1"]
    h = (h - p["running_mean"]) / jnp.sqrt(p["running_var"] + BN_EPS)
    h = h * p["gamma"] + p["beta"]
    h = jnp.where(h >= 0.0, h, LEAKY_SLOPE * h)
    return h @ p["w2"] + p["b2"]


def class_block_ref_matched(x, p):
    """Reference using the same folded-BN / bf16-matmul recipe as the kernel."""
    scale = p["gamma"] * jax.lax.rsqrt(p["running_var"] + BN_EPS)
    w1_f = (p["w1"] * scale[None, :]).astype(jnp.bfloat16)
    b1_f = (p["b1"] - p["running_mean"]) * scale + p["beta"]
    h = jnp.dot(x.astype(jnp.bfloat16), w1_f,
                preferred_element_type=jnp.float32) + b1_f
    h = jnp.where(h >= 0.0, h, LEAKY_SLOPE * h)
    return jnp.dot(h.astype(jnp.bfloat16), p["w2"].astype(jnp.bfloat16),
                   preferred_element_type=jnp.float32) + p["b2"]


if __name__ == "__main__":
    key = jax.random.PRNGKey(0)
    k_x, k_p = jax.random.split(key)

    batch = 8
    input_dim = 64
    class_num = 16
    num_bottleneck = 512   # module default

    x = jax.random.normal(k_x, (batch, input_dim), jnp.float32)
    params = init_params(k_p, input_dim, class_num, num_bottleneck)
    prep = prepare_params(params)          # one-time: fold BN, pad, cast

    out = class_block_forward(x, prep)
    out = jax.block_until_ready(out)
    assert out.shape == (batch, class_num)

    # Tight check vs a reference that uses the identical bf16-matmul recipe.
    ref_m = class_block_ref_matched(x, params)
    assert jnp.allclose(out, ref_m, atol=2e-3, rtol=2e-3), (
        f"max err vs matched ref {jnp.max(jnp.abs(out - ref_m))}")

    # Sanity check vs the full-f32 PyTorch-equivalent math (bf16-loose tol).
    ref_f = class_block_ref_f32(x, params)
    scale_mag = jnp.maximum(jnp.max(jnp.abs(ref_f)), 1e-3)
    assert jnp.max(jnp.abs(out - ref_f)) < 2e-2 * scale_mag, (
        f"max err vs f32 ref {jnp.max(jnp.abs(out - ref_f))}")

    print("KERNEL_OK")
</pallas_src>

<mosaic_0001>
module attributes {stable_mosaic.version = 11 : i64} {
  func.func @classblock_kernel(%arg0: i32, %arg1: memref<8x64xbf16, #tpu.memory_space<vmem>>, %arg2: memref<64x512xbf16, #tpu.memory_space<vmem>>, %arg3: memref<1x512xf32, #tpu.memory_space<vmem>>, %arg4: memref<512x128xbf16, #tpu.memory_space<vmem>>, %arg5: memref<1x128xf32, #tpu.memory_space<vmem>>, %arg6: memref<8x128xf32, #tpu.memory_space<vmem>>) attributes {dimension_semantics = [#tpu.dimension_semantics<parallel>], iteration_bounds = array<i64: 1>, scalar_prefetch = 0 : i64, scratch_operands = 0 : i64, tpu.core_type = #tpu.core_type<tc>, window_params = [{transform_indices = @transform_0, window_bounds = array<i64: 8, 64>}, {pipeline_mode = #tpu.pipeline_mode<synchronous>, transform_indices = @transform_1, window_bounds = array<i64: 64, 512>}, {pipeline_mode = #tpu.pipeline_mode<synchronous>, transform_indices = @transform_2, window_bounds = array<i64: 1, 512>}, {pipeline_mode = #tpu.pipeline_mode<synchronous>, transform_indices = @transform_3, window_bounds = array<i64: 512, 128>}, {pipeline_mode = #tpu.pipeline_mode<synchronous>, transform_indices = @transform_4, window_bounds = array<i64: 1, 128>}, {transform_indices = @transform_5, window_bounds = array<i64: 8, 128>}]} {
    %c0 = arith.constant 0 : index
    %c0_0 = arith.constant 0 : index
    %0 = vector.load %arg1[%c0, %c0_0] : memref<8x64xbf16, #tpu.memory_space<vmem>>, vector<8x64xbf16>
    %c0_1 = arith.constant 0 : index
    %c0_2 = arith.constant 0 : index
    %1 = vector.load %arg2[%c0_1, %c0_2] : memref<64x512xbf16, #tpu.memory_space<vmem>>, vector<64x512xbf16>
    %cst = arith.constant dense<0.000000e+00> : vector<8x512xf32>
    %2 = tpu.matmul %0, %1, %cst {dimension_numbers = #tpu.dot_dimension_numbers<[1], [0], [0], [1], [0, 0, 1, 1], [], []>} : vector<8x64xbf16>, vector<64x512xbf16>, vector<8x512xf32> -> vector<8x512xf32>
    %c0_3 = arith.constant 0 : index
    %c0_4 = arith.constant 0 : index
    %3 = vector.load %arg3[%c0_3, %c0_4] : memref<1x512xf32, #tpu.memory_space<vmem>>, vector<1x512xf32>
    %4 = vector.broadcast %3 : vector<1x512xf32> to vector<8x512xf32>
    %5 = arith.addf %2, %4 : vector<8x512xf32>
    %cst_5 = arith.constant 0.000000e+00 : f32
    %6 = vector.broadcast %cst_5 : f32 to vector<8x512xf32>
    %7 = arith.cmpf oge, %5, %6 : vector<8x512xf32>
    %cst_6 = arith.constant 1.000000e-01 : f32
    %8 = vector.broadcast %cst_6 : f32 to vector<8x512xf32>
    %9 = arith.mulf %8, %5 : vector<8x512xf32>
    %10 = arith.select %7, %5, %9 : vector<8x512xi1>, vector<8x512xf32>
    %11 = arith.truncf %10 : vector<8x512xf32> to vector<8x512xbf16>
    %c0_7 = arith.constant 0 : index
    %c0_8 = arith.constant 0 : index
    %12 = vector.load %arg4[%c0_7, %c0_8] : memref<512x128xbf16, #tpu.memory_space<vmem>>, vector<512x128xbf16>
    %cst_9 = arith.constant dense<0.000000e+00> : vector<8x128xf32>
    %13 = tpu.matmul %11, %12, %cst_9 {dimension_numbers = #tpu.dot_dimension_numbers<[1], [0], [0], [1], [0, 0, 1, 1], [], []>} : vector<8x512xbf16>, vector<512x128xbf16>, vector<8x128xf32> -> vector<8x128xf32>
    %c0_10 = arith.constant 0 : index
    %c0_11 = arith.constant 0 : index
    %14 = vector.load %arg5[%c0_10, %c0_11] : memref<1x128xf32, #tpu.memory_space<vmem>>, vector<1x128xf32>
    %15 = vector.broadcast %14 : vector<1x128xf32> to vector<8x128xf32>
    %16 = arith.addf %13, %15 : vector<8x128xf32>
    %c0_12 = arith.constant 0 : index
    %c0_13 = arith.constant 0 : index
    %17 = vector.load %arg6[%c0_12, %c0_13] : memref<8x128xf32, #tpu.memory_space<vmem>>, vector<8x128xf32>
    tpu.vector_store %arg6[%c0_12, %c0_13], %16 {strides = array<i32>} : memref<8x128xf32, #tpu.memory_space<vmem>>, vector<8x128xf32>,
    return
  }
  func.func @transform_0(%arg0: i32) -> (i32, i32) {
    %c0_i32 = arith.constant 0 : i32
    %c0_i32_0 = arith.constant 0 : i32
    return %arg0, %c0_i32 : i32, i32
  }
  func.func @transform_1(%arg0: i32) -> (i32, i32) {
    %c0_i32 = arith.constant 0 : i32
    %c0_i32_0 = arith.constant 0 : i32
    %c0_i32_1 = arith.constant 0 : i32
    return %c0_i32, %c0_i32_0 : i32, i32
  }
  func.func @transform_2(%arg0: i32) -> (i32, i32) {
    %c0_i32 = arith.constant 0 : i32
    %c0_i32_0 = arith.constant 0 : i32
    %c0_i32_1 = arith.constant 0 : i32
    return %c0_i32, %c0_i32_0 : i32, i32
  }
  func.func @transform_3(%arg0: i32) -> (i32, i32) {
    %c0_i32 = arith.constant 0 : i32
    %c0_i32_0 = arith.constant 0 : i32
    %c0_i32_1 = arith.constant 0 : i32
    return %c0_i32, %c0_i32_0 : i32, i32
  }
  func.func @transform_4(%arg0: i32) -> (i32, i32) {
    %c0_i32 = arith.constant 0 : i32
    %c0_i32_0 = arith.constant 0 : i32
    %c0_i32_1 = arith.constant 0 : i32
    return %c0_i32, %c0_i32_0 : i32, i32
  }
  func.func @transform_5(%arg0: i32) -> (i32, i32) {
    %c0_i32 = arith.constant 0 : i32
    %c0_i32_0 = arith.constant 0 : i32
    return %arg0, %c0_i32 : i32, i32
  }
}

</mosaic_0001>

<bundles_post_ra>
// kernel: tpu_custom_call.1
= control target key start
LH: loop header
LB: loop body
LE: loop exit
PB: predicated region body
PF: predicated region fallthrough
CT: control target
= control target key end

     0   :  { %10 = vsyncpa [#allocation3], 0  ;;  %s1031_s0 = inlined_call_operand.hbm [shape: bf16[8,64], index: 0, kind: input, shape index: {}]   ;;  %s1032_s1 = inlined_call_operand.hbm [shape: bf16[64,512], index: 1, kind: input, shape index: {}]   ;;  %s1033_s2 = inlined_call_operand.hbm [shape: f32[1,512], index: 2, kind: input, shape index: {}]   ;;  %s1034_s3 = inlined_call_operand.hbm [shape: bf16[512,128], index: 3, kind: input, shape index: {}]   ;;  %s1035_s4 = inlined_call_operand.vmem [shape: f32[1,128], index: 4, kind: input, shape index: {}]   ;;  %s1036_s5 = inlined_call_operand.hbm [shape: f32[8,128], index: 5, kind: output, shape index: {}]  }
   0x1   :  { %11 = vsyncpa [#allocation6], 0 }
   0x2   :  { %12 = vsyncpa [#allocation9], 0  ;;  %s29_s20 = sshll.u32 %s1032_s1, 4  ;;  %s30_s20 = int_to_ptr.hbm [resolvable:$true] %s29_s20 }
   0x3   :  { %13 = vsyncpa [#allocation4], 0  ;;  %s974_s21 = smov [#allocation5]   ;;  %s19_s25 = sshll.u32 %s1031_s0, 4  ;;  %s20_s25 = int_to_ptr.hbm [resolvable:$true] %s19_s25 }
   0x4   :  { %s31_s22 = sshll.u32 %s974_s21, 4  ;;  %s975_s26 = smov 256   ;;  %s32_s22 = int_to_ptr.vmem [resolvable:$true] %s31_s22 }
   0x5   :  { %s976_s27 = smov 16   ;;  %s977_s28 = smov [#allocation2]  }
   0x6   :  { %37 = dma.hbm_to_vmem [thread:$0]  %s30_s20, 2048, %s32_s22, [#allocation6], %s975_s26, %s975_s26, %s976_s27  }
   0x7   :  { %s21_s29 = sshll.u32 %s977_s28, 4  ;;  %s43_s7 = sshll.u32 %s1033_s2, 4  ;;  %s22_s29 = int_to_ptr.vmem [resolvable:$true] %s21_s29  ;;  %s44_s7 = int_to_ptr.hbm [resolvable:$true] %s43_s7 }
   0x8   :  { %24 = dma.hbm_to_vmem [thread:$0]  %s20_s25, 64, %s22_s29, [#allocation3]  }
   0x9   :  { %s53_s9 = sshll.u32 %s1034_s3, 4  ;;  %s978_s10 = smov [#allocation7]   ;;  %s54_s9 = int_to_ptr.hbm [resolvable:$true] %s53_s9 }
   0xa   :  { %s45_s11 = sshll.u32 %s978_s10, 4  ;;  %s979_s0 = smov [#allocation8]   ;;  %s46_s11 = int_to_ptr.vmem [resolvable:$true] %s45_s11 }
   0xb   :  { %48 = dma.hbm_to_vmem [thread:$0]  %s44_s7, 64, %s46_s11, [#allocation6]  }
   0xc   :  { %s55_s12 = sshll.u32 %s979_s0, 4  ;;  %s980_s13 = smov 64   ;;  %s56_s12 = int_to_ptr.vmem [resolvable:$true] %s55_s12 }
   0xd   :  { %s981_s14 = smov 4  }
   0xe   :  { %61 = dma.hbm_to_vmem [thread:$0]  %s54_s9, 4096, %s56_s12, [#allocation9], %s980_s13, %s980_s13, %s981_s14  }
   0xf   :  { %966 = dma.done.wait [#allocation3], 64  }
  0x10   :  { %967 = vsyncadd [#allocation3], 4294967232 }
  0x11   :  { %968 = dma.done.wait [#allocation6], 2112  }
  0x12   :  { %969 = vsyncadd [#allocation6], 4294965184 }
  0x13   :  { %970 = dma.done.wait [#allocation9], 4096  }
  0x14   :  { %971 = vsyncadd [#allocation9], 4294963200  ;;  %v642_v0 = vld [vmem:[#allocation5 + $0x60] sm:$0xf]  ;;  %v802_v1 = vld [vmem:[#allocation5 + $0x6c] sm:$0xf0] }
  0x15   :  { %v650_v2 = vld [vmem:[#allocation5 + $0x68] sm:$0xf]  ;;  %v643_v3 = vor.u32 %v802_v1, %v642_v0  ;;  %v803_v4 = vld [vmem:[#allocation5 + $0x74] sm:$0xf0]  ;;  %v801_v5 = vld [vmem:[#allocation5 + $0x6c] sm:$0xf] }
  0x16   :  { %v652_v6 = vld [vmem:[#allocation5 + $0x78] sm:$0xf0]  ;;  %v651_v7 = vor.u32 %v803_v4, %v650_v2  ;;  %v800_v9 = vld [vmem:[#allocation5 + $0x64] sm:$0xf]  ;;  %v644_v10 = vld [vmem:[#allocation5 + $0x70] sm:$0xf0] }
  0x17   :  { %v655_v8 = vor.u32 %v801_v5, %v652_v6  ;;  %v626_v11 = vld [vmem:[#allocation5 + $0x40] sm:$0xf]  ;;  %196 = vmatpush.bf16.msra.mxu0 %v643_v3  ;;  %v647_v12 = vor.u32 %v800_v9, %v644_v10  ;;  %v798_v13 = vld [vmem:[#allocation5 + $0x4c] sm:$0xf0]  ;;  %v634_v14 = vld [vmem:[#allocation5 + $0x48] sm:$0xf] }
  0x18   :  { %v799_v15 = vld [vmem:[#allocation5 + $0x54] sm:$0xf0]  ;;  %222 = vmatpush.bf16.msra.mxu2 %v651_v7  ;;  %v627_v16 = vor.u32 %v798_v13, %v626_v11  ;;  %v797_v18 = vld [vmem:[#allocation5 + $0x4c] sm:$0xf]  ;;  %v636_v19 = vld [vmem:[#allocation5 + $0x58] sm:$0xf0] }
  0x19   :  { %235 = vmatpush.bf16.msra.mxu3 %v655_v8  ;;  %v635_v17 = vor.u32 %v799_v15, %v634_v14  ;;  %v796_v20 = vld [vmem:[#allocation5 + $0x44] sm:$0xf]  ;;  %209 = vmatpush.bf16.msra.mxu1 %v647_v12  ;;  %v639_v21 = vor.u32 %v797_v18, %v636_v19  ;;  %v628_v22 = vld [vmem:[#allocation5 + $0x50] sm:$0xf0]  ;;  %v610_v23 = vld [vmem:[#allocation5 + $0x20] sm:$0xf] }
  0x1a   :  { %v794_v24 = vld [vmem:[#allocation5 + $0x2c] sm:$0xf0]  ;;  %v631_v25 = vor.u32 %v796_v20, %v628_v22  ;;  %v618_v26 = vld [vmem:[#allocation5 + $0x28] sm:$0xf]  ;;  %v795_v27 = vld [vmem:[#allocation5 + $0x34] sm:$0xf0] }
  0x1b   :  { %v793_v28 = vld [vmem:[#allocation5 + $0x2c] sm:$0xf]  ;;  %197 = vmatpush.bf16.msra.mxu0 %v627_v16  ;;  %v611_v29 = vor.u32 %v794_v24, %v610_v23  ;;  %v620_v30 = vld [vmem:[#allocation5 + $0x38] sm:$0xf0]  ;;  %v792_v31 = vld [vmem:[#allocation5 + $0x24] sm:$0xf]  ;;  %v619_v33 = vor.u32 %v795_v27, %v618_v26 }
  0x1c   :  { %v612_v32 = vld [vmem:[#allocation5 + $0x30] sm:$0xf0]  ;;  %223 = vmatpush.bf16.msra.mxu2 %v635_v17  ;;  %v623_v34 = vor.u32 %v793_v28, %v620_v30  ;;  %v594_v35 = vld [vmem:[#allocation5] sm:$0xf]  ;;  %v790_v36 = vld [vmem:[#allocation5 + $0xc] sm:$0xf0] }
  0x1d   :  { %236 = vmatpush.bf16.msra.mxu3 %v639_v21  ;;  %v602_v37 = vld [vmem:[#allocation5 + $0x8] sm:$0xf]  ;;  %210 = vmatpush.bf16.msra.mxu1 %v631_v25  ;;  %v615_v38 = vor.u32 %v792_v31, %v612_v32  ;;  %v791_v39 = vld [vmem:[#allocation5 + $0x14] sm:$0xf0]  ;;  %v789_v40 = vld [vmem:[#allocation5 + $0xc] sm:$0xf]  ;;  %v595_v44 = vor.u32 %v790_v36, %v594_v35 }
  0x1e   :  { %v604_v41 = vld [vmem:[#allocation5 + $0x18] sm:$0xf0]  ;;  %v788_v42 = vld [vmem:[#allocation5 + $0x4] sm:$0xf]  ;;  %v596_v43 = vld [vmem:[#allocation5 + $0x10] sm:$0xf0]  ;;  %v603_v45 = vor.u32 %v791_v39, %v602_v37 }
  0x1f   :  { %198 = vmatpush.bf16.msra.mxu0 %v611_v29  ;;  %v607_v46 = vor.u32 %v789_v40, %v604_v41  ;;  %v599_v47 = vor.u32 %v788_v42, %v596_v43  ;;  %v811_v48 = vld [vmem:[#allocation8 + $0x38] sm:$0xff]  ;;  %vm188_vm0 = vcmask 523264   ;;  %v810_v52 = vld [vmem:[#allocation8 + $0x30] sm:$0xff]  ;;  %v809_v56 = vld [vmem:[#allocation8 + $0x28] sm:$0xff]  ;;  %s982_s15 = smov [#allocation10]   ;;  %s580_s19 = sshll.u32 %s1036_s5, 4  ;;  %s581_s19 = int_to_ptr.hbm [resolvable:$true] %s580_s19 }
  0x20   :  { %224 = vmatpush.bf16.msra.mxu2 %v619_v33  ;;  %v819_v49 = vld [vmem:[#allocation8 + $0x78] sm:$0xff]  ;;  %v818_v54 = vld [vmem:[#allocation8 + $0x70] sm:$0xff]  ;;  %v817_v58 = vld [vmem:[#allocation8 + $0x68] sm:$0xff]  ;;  %s578_s16 = sshll.u32 %s982_s15, 4  ;;  %s579_s16 = int_to_ptr.vmem [resolvable:$true] %s578_s16 }
  0x21   :  { %237 = vmatpush.bf16.msra.mxu3 %v623_v34  ;;  %211 = vmatpush.bf16.msra.mxu1 %v615_v38  ;;  %v81_v50 = vld [vmem:[#allocation2] sm:$0xf]  ;;  %v826_v55 = vld [vmem:[#allocation8 + $0xb0] sm:$0xff]  ;;  %v825_v59 = vld [vmem:[#allocation8 + $0xa8] sm:$0xff] }
  0x22   :  { %v827_v51 = vld [vmem:[#allocation8 + $0xb8] sm:$0xff]  ;;  %v834_v57 = vld [vmem:[#allocation8 + $0xf0] sm:$0xff]  ;;  %v808_v60 = vld [vmem:[#allocation8 + $0x20] sm:$0xff] }
  0x23   :  { %199 = vmatpush.bf16.msra.mxu0 %v595_v44  ;;  %v835_v53 = vld [vmem:[#allocation8 + $0xf8] sm:$0xff]  ;;  %v833_v61 = vld [vmem:[#allocation8 + $0xe8] sm:$0xff]  ;;  %v816_v62 = vld [vmem:[#allocation8 + $0x60] sm:$0xff] }
  0x24   :  { %225 = vmatpush.bf16.msra.mxu2 %v603_v45  ;;  %v824_v63 = vld [vmem:[#allocation8 + $0xa0] sm:$0xff]  ;;  %v807_v0 = vld [vmem:[#allocation8 + $0x18] sm:$0xff]  ;;  %v806_v4 = vld [vmem:[#allocation8 + $0x10] sm:$0xff] }
  0x25   :  { %238 = vmatpush.bf16.msra.mxu3 %v607_v46  ;;  %212 = vmatpush.bf16.msra.mxu1 %v599_v47  ;;  %v832_v1 = vld [vmem:[#allocation8 + $0xe0] sm:$0xff]  ;;  %v815_v2 = vld [vmem:[#allocation8 + $0x58] sm:$0xff]  ;;  %v814_v6 = vld [vmem:[#allocation8 + $0x50] sm:$0xff] }
  0x26   :  { %656 = vmatmul.msk.bf16.vlgmr.msra.gmra.mxu0 %vm188_vm0, %v81_v50  ;;  %v823_v3 = vld [vmem:[#allocation8 + $0x98] sm:$0xff]  ;;  %v805_v7 = vld [vmem:[#allocation8 + $0x8] sm:$0xff]  ;;  %v822_v9 = vld [vmem:[#allocation8 + $0x90] sm:$0xff] }
  0x27   :  { %520 = vmatpush.bf16.msrb.mxu0 %v811_v48  ;;  %658 = vmatmul.msk.bf16.vlgmr.msra.gmra.mxu2 %vm188_vm0, %v81_v50  ;;  %v831_v5 = vld [vmem:[#allocation8 + $0xd8] sm:$0xff]  ;;  %v813_v8 = vld [vmem:[#allocation8 + $0x48] sm:$0xff]  ;;  %v830_v10 = vld [vmem:[#allocation8 + $0xd0] sm:$0xff] }
  0x28   :  { %659 = vmatmul.msk.bf16.vlgmr.msra.gmra.mxu3 %vm188_vm0, %v81_v50  ;;  %657 = vmatmul.msk.bf16.vlgmr.msra.gmra.mxu1 %vm188_vm0, %v81_v50  ;;  %v804_v11 = vld [vmem:[#allocation8] sm:$0xff]  ;;  %v821_v13 = vld [vmem:[#allocation8 + $0x88] sm:$0xff]  ;;  %v98_v17 = vld [vmem:[#allocation7] sm:$0xf] }
  0x29   :  { %533 = vmatpush.bf16.msrb.mxu1 %v819_v49  ;;  %546 = vmatpush.bf16.msrb.mxu2 %v827_v51  ;;  %v812_v12 = vld [vmem:[#allocation8 + $0x40] sm:$0xff]  ;;  %v829_v14 = vld [vmem:[#allocation8 + $0xc8] sm:$0xff]  ;;  %v100_v18 = vperm.slane %v98_v17, 0  ;;  %v101_v19 = vperm.slane %v98_v17, 1  ;;  %v102_v25 = vperm.slane %v98_v17, 2  ;;  %v103_v26 = vperm.slane %v98_v17, 3 }
  0x2a   :  { %559 = vmatpush.bf16.msrb.mxu3 %v835_v53  ;;  %v820_v15 = vld [vmem:[#allocation8 + $0x80] sm:$0xff]  ;;  %v845_v47 = vld [vmem:[%s1035_s4] ss:$0 sm:$0xff] }
  0x2b   :  { %521 = vmatpush.bf16.msrb.mxu0 %v810_v52  ;;  %v828_v16 = vld [vmem:[#allocation8 + $0xc0] sm:$0xff] }
  0x2d   :  { %534 = vmatpush.bf16.msrb.mxu1 %v818_v54  ;;  %547 = vmatpush.bf16.msrb.mxu2 %v826_v55 }
  0x2e   :  { %560 = vmatpush.bf16.msrb.mxu3 %v834_v57 }
  0x2f   :  { %522 = vmatpush.bf16.msrb.mxu0 %v809_v56 }
  0x31   :  { %535 = vmatpush.bf16.msrb.mxu1 %v817_v58  ;;  %548 = vmatpush.bf16.msrb.mxu2 %v825_v59 }
  0x32   :  { %561 = vmatpush.bf16.msrb.mxu3 %v833_v61 }
  0x33   :  { %523 = vmatpush.bf16.msrb.mxu0 %v808_v60 }
  0x35   :  { %536 = vmatpush.bf16.msrb.mxu1 %v816_v62  ;;  %549 = vmatpush.bf16.msrb.mxu2 %v824_v63 }
  0x36   :  { %562 = vmatpush.bf16.msrb.mxu3 %v832_v1 }
  0x37   :  { %524 = vmatpush.bf16.msrb.mxu0 %v807_v0 }
  0x39   :  { %537 = vmatpush.bf16.msrb.mxu1 %v815_v2  ;;  %550 = vmatpush.bf16.msrb.mxu2 %v823_v3 }
  0x3a   :  { %563 = vmatpush.bf16.msrb.mxu3 %v831_v5 }
  0x3b   :  { %525 = vmatpush.bf16.msrb.mxu0 %v806_v4 }
  0x3d   :  { %538 = vmatpush.bf16.msrb.mxu1 %v814_v6  ;;  %551 = vmatpush.bf16.msrb.mxu2 %v822_v9 }
  0x3e   :  { %564 = vmatpush.bf16.msrb.mxu3 %v830_v10 }
  0x3f   :  { %526 = vmatpush.bf16.msrb.mxu0 %v805_v7 }
  0x41   :  { %539 = vmatpush.bf16.msrb.mxu1 %v813_v8  ;;  %552 = vmatpush.bf16.msrb.mxu2 %v821_v13 }
  0x42   :  { %565 = vmatpush.bf16.msrb.mxu3 %v829_v14 }
  0x43   :  { %527 = vmatpush.bf16.msrb.mxu0 %v804_v11 }
  0x45   :  { %540 = vmatpush.bf16.msrb.mxu1 %v812_v12  ;;  %553 = vmatpush.bf16.msrb.mxu2 %v820_v15 }
  0x46   :  { %566 = vmatpush.bf16.msrb.mxu3 %v828_v16 }
  0xa3   :  { %v201_v20 = vpop.f32.mrf.mxu0 }
  0xa4   :  { %v202_v21 = vadd.f32 %v201_v20, %v100_v18 }
  0xa5   :  { %v214_v22 = vpop.f32.mrf.mxu1 }
  0xa6   :  { %vm244_vm1 = vcmp.ge.f32.partialorder %v202_v21, 0.0  ;;  %v248_v23 = vmul.f32 0.1, %v202_v21  ;;  %v215_v24 = vadd.f32 %v214_v22, %v101_v19 }
  0xa8   :  { %vm245_vm2 = vcmp.ge.f32.partialorder %v215_v24, 0.0  ;;  %v249_v27 = vmul.f32 0.1, %v215_v24  ;;  %v252_v28 = vsel %vm244_vm1, %v202_v21, %v248_v23 }
  0xa9   :  { %v256_v29 = vpack.c.bf16 %v252_v28, %v252_v28 }
  0xaa   :  { %v227_v30 = vpop.f32.mrf.mxu2  ;;  %v253_v32 = vsel %vm245_vm2, %v215_v24, %v249_v27 }
  0xab   :  { %v240_v31 = vpop.f32.mrf.mxu3  ;;  %v228_v33 = vadd.f32 %v227_v30, %v102_v25  ;;  %528 = vmatmul.bf16.vlgmr.msrb.gmra.mxu0 %v256_v29  ;;  %v203_v35 = vpop.f32.mrf.mxu0  ;;  %v257_v36 = vpack.c.bf16 %v253_v32, %v253_v32 }
  0xac   :  { %v241_v34 = vadd.f32 %v240_v31, %v103_v26 }
  0xad   :  { %vm246_vm3 = vcmp.ge.f32.partialorder %v228_v33, 0.0  ;;  %v250_v37 = vmul.f32 0.1, %v228_v33  ;;  %541 = vmatmul.bf16.vlgmr.msrb.gmra.mxu1 %v257_v36  ;;  %v216_v39 = vpop.f32.mrf.mxu1 }
  0xae   :  { %vm247_vm4 = vcmp.ge.f32.partialorder %v241_v34, 0.0  ;;  %v251_v38 = vmul.f32 0.1, %v241_v34 }
  0xaf   :  { %v254_v40 = vsel %vm246_vm3, %v228_v33, %v250_v37 }
  0xb0   :  { %v255_v41 = vsel %vm247_vm4, %v241_v34, %v251_v38  ;;  %v258_v42 = vpack.c.bf16 %v254_v40, %v254_v40 }
  0xb1   :  { %v259_v43 = vpack.c.bf16 %v255_v41, %v255_v41 }
  0xb2   :  { %v229_v44 = vpop.f32.mrf.mxu2  ;;  %554 = vmatmul.bf16.vlgmr.msrb.gmra.mxu2 %v258_v42 }
  0xb3   :  { %v242_v45 = vpop.f32.mrf.mxu3  ;;  %567 = vmatmul.bf16.vlgmr.msrb.gmra.mxu3 %v259_v43 }
 0x128   :  { %v529_v46 = vpop.f32.mrf.mxu0 }
 0x129   :  { %v530_v49 = vadd.f32 %v845_v47, %v529_v46 }
 0x12a   :  { %v542_v48 = vpop.f32.mrf.mxu1 }
 0x12b   :  { %v543_v51 = vadd.f32 %v542_v48, %v530_v49 }
 0x130   :  { %v531_v50 = vpop.f32.mrf.mxu0 }
 0x132   :  { %v544_v52 = vpop.f32.mrf.mxu1 }
 0x135   :  { %v555_v53 = vpop.f32.mrf.mxu2 }
 0x136   :  { %v568_v54 = vpop.f32.mrf.mxu3  ;;  %v556_v55 = vadd.f32 %v555_v53, %v543_v51 }
 0x138   :  { %v569_v56 = vadd.f32 %v568_v54, %v556_v55 }
 0x13a   :  { %572 = vst [vmem:[#allocation10] sm:$0xff] %v569_v56 }
 0x13b   :  { %583 = dma.vmem_to_hbm [thread:$0]  %s579_s16, 128, %s581_s19, [#allocation4]  }
 0x13d   :  { %v557_v57 = vpop.f32.mrf.mxu2 }
 0x13e   :  { %v570_v58 = vpop.f32.mrf.mxu3 }
 0x13f   :  { %972 = dma.done.wait [#allocation4], 128  }
 0x140   :  { %973 = vsyncadd [#allocation4], 4294967168 }
 0x141   :  { %588 = vsyncpa [#allocation3], 1 }
 0x142   :  { %589 = vsyncpa [#allocation6], 1 }
 0x143   :  { %590 = vsyncpa [#allocation9], 1 }
 0x144   :  { %591 = vsyncpa [#allocation4], 1 }

</bundles_post_ra>
